<compile_context>
chip_gen: v7x
topology: tpu7x:2x2x1
jax: 0.10.0
libtpu: 0.0.40
codegen_flags: <defaults>
</compile_context>

<pallas_src>
import functools

import numpy as np
import jax
import jax.numpy as jnp
from jax import lax
from jax.experimental import pallas as pl
from jax.experimental.pallas import tpu as pltpu


def _round_up(n, m):
    return ((n + m - 1) // m) * m


# ----------------------------------------------------------------------------
# One-shot probe: pin down which direction pltpu.roll moves rows for a positive
# shift (jnp.roll-like or not), so the tap/pool shifts below are correct on any
# jax/Mosaic version.  Runs a trivial kernel once; result is cached.
# ----------------------------------------------------------------------------
@functools.lru_cache(maxsize=None)
def _roll_matches_jnp_roll():
    def k(x_ref, o_ref):
        o_ref[...] = pltpu.roll(x_ref[...], 1, axis=0)

    x = jnp.tile(jnp.arange(8, dtype=jnp.float32)[:, None], (1, 128))
    y = pl.pallas_call(k, out_shape=jax.ShapeDtypeStruct((8, 128), jnp.float32))(x)
    return bool(y[1, 0] == x[0, 0])          # jnp.roll(x, 1, 0)[1] == x[0]


# ----------------------------------------------------------------------------
# Kernel
# ----------------------------------------------------------------------------
def _flow_classifier_kernel(B_T, F, H, roll_like_jnp,
                            x_ref, w1_ref, b1_ref, w2_ref, b2_ref,
                            wih_ref, whh_ref, bg_ref,
                            wfc1_ref, bfc1_ref, wfc2_ref, bfc2_ref,
                            out_ref,
                            s1_ref, s2_ref, xp_ref):
    f32 = jnp.float32
    mdt = w2_ref.dtype                            # MXU operand dtype (f32 or bf16)
    prec = lax.Precision.HIGHEST if mdt == jnp.float32 else None
    L1 = F // 2                                   # length after pool1
    T = L1 // 2                                   # length after pool2 == LSTM steps
    rows_f = B_T * F
    rows_p = B_T * L1
    H4 = 4 * H

    def mm(a, b):                                 # MXU matmul, f32 accumulation
        return jnp.dot(a.astype(mdt), b, preferred_element_type=f32, precision=prec)

    def shift_down(v):                            # out[r] = v[r - 1]  (wrap masked later)
        n = v.shape[0]
        return pltpu.roll(v, 1 if roll_like_jnp else n - 1, axis=0)

    def shift_up(v):                              # out[r] = v[r + 1]  (wrap masked / unread)
        n = v.shape[0]
        return pltpu.roll(v, n - 1 if roll_like_jnp else 1, axis=0)

    # ---- conv1: Conv1d(1, 32, k=3, pad=1) as three broadcast FMAs (VPU) ----
    xc = x_ref[...]                                              # (rows_f, 1), rows = b*F + l
    pos_f = lax.broadcasted_iota(jnp.int32, (rows_f, 1), 0) % F
    left1 = jnp.where(pos_f == 0, 0.0, shift_down(xc))           # x[l-1], zero at seq start
    right1 = jnp.where(pos_f == F - 1, 0.0, shift_up(xc))        # x[l+1], zero at seq end
    w1 = w1_ref[...]                                             # (3, 32): taps x channels
    h1 = left1 * w1[0:1, :] + xc * w1[1:2, :] + right1 * w1[2:3, :] + b1_ref[...]
    h1 = jnp.maximum(h1, 0.0)                                    # (rows_f, 32)

    # ---- maxpool1(k=2): in-register max with next row, ONE strided read ----
    s1_ref[...] = jnp.maximum(h1, shift_up(h1))                  # m[r] = max(h1[r], h1[r+1])
    h1p = s1_ref[pl.ds(0, rows_p, stride=2), :]                  # (rows_p, 32), rows b*L1 + j

    # ---- conv2: Conv1d(32, 64, k=3, pad=1) as 3 accumulating K=32 matmuls ----
    pos_p = lax.broadcasted_iota(jnp.int32, (rows_p, 1), 0) % L1
    left2 = jnp.where(pos_p == 0, 0.0, shift_down(h1p))
    right2 = jnp.where(pos_p == L1 - 1, 0.0, shift_up(h1p))
    w2 = w2_ref[...]                                             # (96, 64) = [left|mid|right]
    h2 = (mm(left2, w2[0:32, :]) + mm(h1p, w2[32:64, :]) + mm(right2, w2[64:96, :])
          + b2_ref[...])
    h2 = jnp.maximum(h2, 0.0)                                    # (rows_p, 64)

    # ---- maxpool2(k=2) + time-major reorder (off the recurrent critical path) ----
    s2_ref[...] = jnp.maximum(h2, shift_up(h2))
    h2p_tm = jnp.concatenate(
        [s2_ref[pl.ds(2 * t, B_T, stride=L1), :] for t in range(T)], axis=0)
    # row t*B_T + b == pooled feature at (batch b, time t) -> the recurrence below
    # only does aligned contiguous reads.

    # ---- LSTM: input projection hoisted out of the recurrence, gates fused ----
    xp_ref[...] = mm(h2p_tm, wih_ref[...]) + bg_ref[...]         # (T*B_T, 4H), time-major
    whh = whh_ref[...]                                           # (H, 4H), cols i|f|g|o

    def step(row0, h, c):
        x_t = xp_ref[pl.ds(row0, B_T), :]                        # contiguous, aligned load
        gates = x_t + mm(h, whh)                                 # (B_T, 4H)
        sig = jax.nn.sigmoid(gates)                              # lane-dense EUP pass
        i = sig[:, 0:H]
        f = sig[:, H:2 * H]
        o = sig[:, 3 * H:4 * H]
        g = jnp.tanh(gates[:, 2 * H:3 * H])
        c = f * c + i * g
        h = o * jnp.tanh(c)
        return h, c

    h = jnp.zeros((B_T, H), f32)
    c = jnp.zeros((B_T, H), f32)
    if T <= 16:                                   # small T: static unroll (LLO-visible)
        for t in range(T):
            h, c = step(t * B_T, h, c)
    else:                                         # large T: bound code size / vreg pressure
        def body(t, carry):
            return step(pl.multiple_of(t * B_T, 8), *carry)
        h, c = lax.fori_loop(0, T, body, (h, c))

    # ---- classifier: Linear(H,64) -> ReLU -> Dropout(eval: identity) -> Linear(64,C) ----
    # TODO(synk): training-mode Dropout(0.3) would need pltpu.prng_seed/prng_random_bits.
    z = jnp.maximum(mm(h, wfc1_ref[...]) + bfc1_ref[...], 0.0)
    out_ref[...] = mm(z, wfc2_ref[...]) + bfc2_ref[...]          # lanes padded to >=128


# ----------------------------------------------------------------------------
# Wrapper-side glue
# ----------------------------------------------------------------------------
def _vmem_bytes(b_tile, F, H, out_lanes):
    """Lane-padded f32 VMEM footprint estimate for one grid step."""
    L1, T = F // 2, F // 4
    lane = lambda c: _round_up(max(c, 1), 128)
    by = 4
    inp = 2 * b_tile * F * lane(1) * by           # x column block, double-buffered
    s1 = b_tile * F * lane(32) * by
    s2 = b_tile * L1 * lane(64) * by
    xp = b_tile * T * lane(4 * H) * by
    out = 2 * b_tile * lane(out_lanes) * by
    wts = 2 * (96 * lane(64) + (64 + H) * lane(4 * H) + H * lane(64)
               + 64 * lane(out_lanes)) * by
    return inp + s1 + s2 + xp + out + wts


def _choose_b_tile(B, F, H, out_lanes, budget=24 * 2 ** 20):
    """Largest batch tile (<=256, VMEM-budgeted for v7x) with >=2 grid steps when possible."""
    b8 = _round_up(max(B, 1), 8)
    tile = min(256, b8)
    while tile > 8 and _vmem_bytes(tile, F, H, out_lanes) > budget:
        tile -= 8
    if b8 >= 16 and _round_up(b8, tile) // tile < 2:
        tile = max(8, (b8 // 2 // 8) * 8)         # shard across both v7x TensorCores
    return tile


def cnn_lstm_flow_classifier(x, params, hidden_size, num_classes, mxu_dtype=jnp.float32):
    roll_like_jnp = _roll_matches_jnp_roll()      # resolved once, outside tracing
    return _forward(x, params, hidden_size, num_classes,
                    np.dtype(mxu_dtype).name, roll_like_jnp)


@functools.partial(jax.jit, static_argnames=("hidden_size", "num_classes",
                                             "mxu_name", "roll_like_jnp"))
def _forward(x, params, hidden_size, num_classes, mxu_name, roll_like_jnp):
    B, F = x.shape
    assert F % 4 == 0 and F >= 4, "feature_dim must be a multiple of 4 (two MaxPool1d(2))"
    H, C = hidden_size, num_classes
    L1, T = F // 2, F // 4
    H4 = 4 * H
    OUT_LANES = max(128, _round_up(C, 128))
    mdt = jnp.bfloat16 if mxu_name == "bfloat16" else jnp.float32

    B_TILE = _choose_b_tile(B, F, H, OUT_LANES)
    B_pad = _round_up(B, B_TILE)
    grid = (B_pad // B_TILE,)
    vmem_limit = int(min(64 * 2 ** 20,
                         max(16 * 2 ** 20, 2 * _vmem_bytes(B_TILE, F, H, OUT_LANES))))

    # activation input: one scalar per row, row index = b*F + l
    x_col = jnp.pad(x.astype(jnp.float32), ((0, B_pad - B), (0, 0))).reshape(B_pad * F, 1)

    # weight re-layouts (cheap, fused under jit); MXU operands optionally bf16
    w1m = jnp.transpose(params["w1"][:, 0, :], (1, 0)).astype(jnp.float32)    # (3, 32)
    b1 = params["b1"].reshape(1, 32).astype(jnp.float32)
    w2m = jnp.transpose(params["w2"], (2, 1, 0)).reshape(96, 64).astype(mdt)  # [left|mid|right]
    b2 = params["b2"].reshape(1, 64).astype(jnp.float32)
    wih = params["wih"].T.astype(mdt)                                         # (64, 4H) i|f|g|o
    whh = params["whh"].T.astype(mdt)                                         # (H, 4H)
    bg = (params["bih"] + params["bhh"]).reshape(1, H4).astype(jnp.float32)
    wfc1 = params["wfc1"].T.astype(mdt)                                       # (H, 64)
    bfc1 = params["bfc1"].reshape(1, 64).astype(jnp.float32)
    wfc2 = jnp.pad(params["wfc2"].T, ((0, 0), (0, OUT_LANES - C))).astype(mdt)
    bfc2 = jnp.pad(params["bfc2"].reshape(1, C),
                   ((0, 0), (0, OUT_LANES - C))).astype(jnp.float32)

    inputs = (x_col, w1m, b1, w2m, b2, wih, whh, bg, wfc1, bfc1, wfc2, bfc2)

    def _rep_spec(a):        # small arrays: same whole-array block for every grid step
        return pl.BlockSpec(a.shape, lambda i: (0, 0))

    in_specs = ([pl.BlockSpec((B_TILE * F, 1), lambda i: (i, 0))]
                + [_rep_spec(a) for a in inputs[1:]])

    flops = 2 * B_pad * (F * 3 * 32 + L1 * 96 * 64 + T * 64 * H4 + T * H * H4
                         + H * 64 + 64 * C)
    transc = B_pad * T * 6 * H
    bytes_acc = 4 * (B_pad * F + B_pad * OUT_LANES) + 4 * (
        3 * 32 + 96 * 64 + (64 + H) * H4 + H4 + H * 64 + 64 + 64 * OUT_LANES + OUT_LANES)

    kernel = functools.partial(_flow_classifier_kernel, B_TILE, F, H, roll_like_jnp)
    out = pl.pallas_call(
        kernel,
        grid=grid,
        in_specs=in_specs,
        out_specs=pl.BlockSpec((B_TILE, OUT_LANES), lambda i: (i, 0)),
        out_shape=jax.ShapeDtypeStruct((B_pad, OUT_LANES), jnp.float32),
        scratch_shapes=[pltpu.VMEM((B_TILE * F, 32), jnp.float32),   # pool1 source
                        pltpu.VMEM((B_TILE * L1, 64), jnp.float32),  # pool2 source
                        pltpu.VMEM((B_TILE * T, H4), jnp.float32)],  # time-major LSTM inputs
        compiler_params=pltpu.CompilerParams(
            dimension_semantics=("parallel",),
            vmem_limit_bytes=vmem_limit),
        cost_estimate=pl.CostEstimate(flops=int(flops),
                                      transcendentals=int(transc),
                                      bytes_accessed=int(bytes_acc)),
    )(*inputs)
    return out[:B, :C]


# ----------------------------------------------------------------------------
# Parameters + pure-JAX reference (PyTorch semantics, eval mode)
# ----------------------------------------------------------------------------
def init_params(key, hidden_size, num_classes):
    H = hidden_size
    ks = jax.random.split(key, 12)

    def u(k, shape, fan_in):
        bound = 1.0 / np.sqrt(fan_in)
        return jax.random.uniform(k, shape, jnp.float32, -bound, bound)

    return {
        "w1": u(ks[0], (32, 1, 3), 3),             # Conv1d(1, 32, 3)
        "b1": u(ks[1], (32,), 3),
        "w2": u(ks[2], (64, 32, 3), 96),           # Conv1d(32, 64, 3)
        "b2": u(ks[3], (64,), 96),
        "wih": u(ks[4], (4 * H, 64), H),           # LSTM weight_ih_l0
        "whh": u(ks[5], (4 * H, H), H),            # LSTM weight_hh_l0
        "bih": u(ks[6], (4 * H,), H),
        "bhh": u(ks[7], (4 * H,), H),
        "wfc1": u(ks[8], (64, H), H),              # Linear(H, 64)
        "bfc1": u(ks[9], (64,), H),
        "wfc2": u(ks[10], (num_classes, 64), 64),  # Linear(64, num_classes)
        "bfc2": u(ks[11], (num_classes,), 64),
    }


def reference_forward(x, p):
    B, F = x.shape
    H = p["whh"].shape[1]
    HI = lax.Precision.HIGHEST

    def conv1d(inp, w, b):   # inp (B, Cin, L), w (Cout, Cin, 3), padding=1
        out = lax.conv_general_dilated(inp, w, window_strides=(1,), padding=((1, 1),),
                                       dimension_numbers=("NCH", "OIH", "NCH"),
                                       precision=HI)
        return out + b[None, :, None]

    h = x[:, None, :]
    h = jnp.maximum(conv1d(h, p["w1"], p["b1"]), 0.0)
    h = h.reshape(B, 32, F // 2, 2).max(axis=-1)                 # MaxPool1d(2)
    h = jnp.maximum(conv1d(h, p["w2"], p["b2"]), 0.0)
    L1 = F // 2
    h = h.reshape(B, 64, L1 // 2, 2).max(axis=-1)
    seq = jnp.transpose(h, (0, 2, 1))                            # (B, T, 64)

    def step(carry, x_t):
        hh, cc = carry
        gates = (jnp.dot(x_t, p["wih"].T, precision=HI)
                 + jnp.dot(hh, p["whh"].T, precision=HI) + p["bih"] + p["bhh"])
        i, f, g, o = jnp.split(gates, 4, axis=-1)
        i, f, o = jax.nn.sigmoid(i), jax.nn.sigmoid(f), jax.nn.sigmoid(o)
        g = jnp.tanh(g)
        cc = f * cc + i * g
        hh = o * jnp.tanh(cc)
        return (hh, cc), None

    init = (jnp.zeros((B, H), jnp.float32), jnp.zeros((B, H), jnp.float32))
    (h_last, _), _ = lax.scan(step, init, jnp.transpose(seq, (1, 0, 2)))

    z = jnp.maximum(jnp.dot(h_last, p["wfc1"].T, precision=HI) + p["bfc1"], 0.0)
    return jnp.dot(z, p["wfc2"].T, precision=HI) + p["bfc2"]     # Dropout = identity (eval)


if __name__ == "__main__":
    B = 2
    feature_dim = 32      # -> LSTM sequence length T = 8 after the two pools
    hidden_size = 32
    num_classes = 10

    key = jax.random.PRNGKey(0)
    kx, kp = jax.random.split(key)
    x = jax.random.normal(kx, (B, feature_dim), jnp.float32)
    params = init_params(kp, hidden_size, num_classes)

    ref = reference_forward(x, params)

    # f32 MXU path (also the right choice on v5e): strict check.
    out = cnn_lstm_flow_classifier(x, params, hidden_size, num_classes,
                                   mxu_dtype=jnp.float32)
    out = jax.block_until_ready(out)
    assert out.shape == (B, num_classes)
    if not bool(jnp.allclose(out, ref, atol=5e-3, rtol=5e-3)):
        raise AssertionError(f"Pallas kernel (f32) mismatch:\n{out}\nvs\n{ref}")

    # bf16 MXU-operand fast path (v6e/v7x): looser tolerance per review.
    out_bf16 = cnn_lstm_flow_classifier(x, params, hidden_size, num_classes,
                                        mxu_dtype=jnp.bfloat16)
    out_bf16 = jax.block_until_ready(out_bf16)
    if not bool(jnp.allclose(out_bf16, ref, atol=6e-2, rtol=6e-2)):
        raise AssertionError(f"Pallas kernel (bf16) mismatch:\n{out_bf16}\nvs\n{ref}")

    print("KERNEL_OK")
</pallas_src>

<mosaic_0001>
module attributes {stable_mosaic.version = 11 : i64} {
  func.func @k(%arg0: memref<8x128xf32, #tpu.memory_space<vmem>>, %arg1: memref<8x128xf32, #tpu.memory_space<vmem>>) attributes {dimension_semantics = [], scalar_prefetch = 0 : i64, scratch_operands = 0 : i64, tpu.core_type = #tpu.core_type<tc>} {
    %c0 = arith.constant 0 : index
    %c0_0 = arith.constant 0 : index
    %0 = vector.load %arg0[%c0, %c0_0] : memref<8x128xf32, #tpu.memory_space<vmem>>, vector<8x128xf32>
    %c1_i32 = arith.constant 1 : i32
    %1 = tpu.dynamic_rotate %0 by %c1_i32 dim 0 : vector<8x128xf32>, i32 -> vector<8x128xf32>
    %c0_1 = arith.constant 0 : index
    %c0_2 = arith.constant 0 : index
    %2 = vector.load %arg1[%c0_1, %c0_2] : memref<8x128xf32, #tpu.memory_space<vmem>>, vector<8x128xf32>
    tpu.vector_store %arg1[%c0_1, %c0_2], %1 {strides = array<i32>} : memref<8x128xf32, #tpu.memory_space<vmem>>, vector<8x128xf32>,
    return
  }
}

</mosaic_0001>

<bundles_post_ra>
// kernel: tpu_custom_call.1
= control target key start
LH: loop header
LB: loop body
LE: loop exit
PB: predicated region body
PF: predicated region fallthrough
CT: control target
= control target key end

     0   :  { %6 = vsyncpa [#allocation3], 0  ;;  %s125_s0 = inlined_call_operand.hbm [shape: f32[8,128], index: 0, kind: input, shape index: {}]   ;;  %s126_s1 = inlined_call_operand.hbm [shape: f32[8,128], index: 1, kind: output, shape index: {}]  }
   0x1   :  { %7 = vsyncpa [#allocation4], 0  ;;  %s89_s6 = smov [#allocation2]   ;;  %s41_s10 = scalar_lea.hbm %s125_s0, 128 }
   0x2   :  { %s14_s7 = sshll.u32 %s89_s6, 4  ;;  %p42_p0 = scmp.ne.s32.totalorder %s125_s0, %s41_s10  ;;  %s15_s7 = int_to_ptr.vmem [resolvable:$true] %s14_s7 }
   0x3   :  { %p45_p1 = scmp.lt.u32.totalorder %s41_s10, %s125_s0 }
   0x5   :  { %p47_p2 = pnand %p45_p1, %p42_p0 }
   0x7   :  { %50 = shalt.err (!%p47_p2)
}
   0x8   :  { %s51_s15 = scalar_lea.vmem %s15_s7, 128  ;;  %p56_p4 = scmp.lt.s32.totalorder %s15_s7, %s15_s7 }
   0x9   :  { %p52_p3 = scmp.ne.s32.totalorder %s15_s7, %s51_s15  ;;  %p57_p5 = scmp.lt.s32.totalorder %s51_s15, %s51_s15 }
   0xb   :  { %p58_p6 = por %p57_p5, %p56_p4 }
   0xd   :  { %p59_p7 = pnand %p58_p6, %p52_p3 }
   0xf   :  { %62 = shalt.err (!%p59_p7)
}
  0x10   :  { %17 = dma.hbm_to_vmem [thread:$0]  %s125_s0, 128, %s15_s7, [#allocation3]  }
  0x11   :  { %85 = dma.done.wait [#allocation3], 128  }
  0x12   :  { %86 = vsyncadd [#allocation3], 4294967168  ;;  %s90_s18 = smov [#allocation5]   ;;  %v21_v0 = vld [vmem:[#allocation2] sm:$0xff] }
  0x13   :  { %s30_s19 = sshll.u32 %s90_s18, 4  ;;  %v22_v1 = vrot.slane %v21_v0, 7  ;;  %s31_s19 = int_to_ptr.vmem [resolvable:$true] %s30_s19 }
  0x14   :  { %s63_s20 = scalar_lea.vmem %s31_s19, 128  ;;  %p68_p9 = scmp.lt.s32.totalorder %s31_s19, %s31_s19 }
  0x15   :  { %23 = vst [vmem:[#allocation5] sm:$0xff] %v22_v1  ;;  %p64_p8 = scmp.ne.s32.totalorder %s31_s19, %s63_s20  ;;  %p69_p10 = scmp.lt.s32.totalorder %s63_s20, %s63_s20 }
  0x17   :  { %p70_p11 = por %p69_p10, %p68_p9 }
  0x19   :  { %p71_p12 = pnand %p70_p11, %p64_p8 }
  0x1b   :  { %74 = shalt.err (!%p71_p12)
}
  0x1c   :  { %s75_s23 = scalar_lea.hbm %s126_s1, 128 }
  0x1d   :  { %p76_p13 = scmp.ne.s32.totalorder %s126_s1, %s75_s23  ;;  %p79_p0 = scmp.lt.u32.totalorder %s75_s23, %s126_s1 }
  0x1f   :  { %p81_p1 = pnand %p79_p0, %p76_p13 }
  0x21   :  { %84 = shalt.err (!%p81_p1)
}
  0x22   :  { %33 = dma.vmem_to_hbm [thread:$0]  %s31_s19, 128, %s126_s1, [#allocation4]  }
  0x23   :  { %87 = dma.done.wait [#allocation4], 128  }
  0x24   :  { %88 = vsyncadd [#allocation4], 4294967168 }
  0x25   :  { %37 = vsyncpa [#allocation3], 1 }
  0x26   :  { %38 = vsyncpa [#allocation4], 1 }

</bundles_post_ra>
